<compile_context>
chip_gen: v5e
topology: v5e:2x2
jax: 0.10.0
libtpu: 0.0.40
codegen_flags: <defaults>
</compile_context>

<pallas_src>
import functools

import jax
import jax.numpy as jnp
from jax.experimental import pallas as pl
from jax.experimental.pallas import tpu as pltpu


def _round_up(x, m):
    return ((x + m - 1) // m) * m


def _image_embeddings_kernel(*refs, use_loc, n_loc):
    if use_loc:
        (x_ref, loc_ref, w_img_ref, w_loc_ref, bias_ref,
         gamma_ref, beta_ref, out_ref) = refs
    else:
        x_ref, w_img_ref, bias_ref, gamma_ref, beta_ref, out_ref = refs
        loc_ref = w_loc_ref = None

    # Image projection on the MXU, f32 accumulation.
    e = jnp.dot(x_ref[...], w_img_ref[...], preferred_element_type=jnp.float32)
    e = e + bias_ref[...]                       # folded (b_img [+ b_loc]) bias

    if use_loc:
        # 5-feature location projection on the VPU: running K=5 through the
        # MXU would pad K to 128 (wasted passes), so do 5 broadcast AXPYs.
        loc = loc_ref[...].astype(jnp.float32)        # (tm, 5)
        w_loc = w_loc_ref[...].astype(jnp.float32)    # (5, H)
        for k in range(n_loc):                        # static unroll, n_loc = 5
            e = e + loc[:, k:k + 1] * w_loc[k:k + 1, :]

    # LayerNorm over the hidden (last) axis, eps = 1e-12 (matches nn.LayerNorm).
    mean = jnp.mean(e, axis=-1, keepdims=True)
    centered = e - mean
    var = jnp.mean(centered * centered, axis=-1, keepdims=True)
    normed = centered * jax.lax.rsqrt(var + 1e-12)
    out = normed * gamma_ref[...] + beta_ref[...]

    # Dropout is identity in eval mode.
    # TODO(synk): training-mode dropout (hidden_dropout_prob) not implemented.
    out_ref[...] = out.astype(out_ref.dtype)


def image_embeddings_forward(input_ids, input_loc, params, *,
                             use_location_embed=True,
                             tm=256,
                             compute_dtype=jnp.bfloat16,
                             out_dtype=jnp.float32,
                             vmem_limit_bytes=48 * 1024 * 1024):
    """input_ids: (B, S, V), input_loc: (B, S, 5) -> (B, S, H)."""
    B, S, V = input_ids.shape
    H = params["w_img"].shape[1]
    R = B * S

    # Row tile: large enough to fill the MXU, but don't over-pad tiny inputs.
    tm_eff = min(tm, _round_up(R, 8))
    Rp = _round_up(R, tm_eff)
    grid = (Rp // tm_eff,)

    x2d = input_ids.reshape(R, V).astype(compute_dtype)
    if Rp != R:
        x2d = jnp.pad(x2d, ((0, Rp - R), (0, 0)))
    w_img = params["w_img"].astype(compute_dtype)

    # Fold both biases into one (1, H) add (they hit every row identically).
    bias = params["b_img"].astype(jnp.float32)
    if use_location_embed:
        bias = bias + params["b_loc"].astype(jnp.float32)
    gamma = params["gamma"].astype(jnp.float32)
    beta = params["beta"].astype(jnp.float32)

    in_specs = [pl.BlockSpec((tm_eff, V), lambda i: (i, 0))]   # streamed rows
    inputs = [x2d]
    flops = 2 * Rp * V * H

    if use_location_embed:
        L = input_loc.shape[-1]
        loc2d = input_loc.reshape(R, L).astype(jnp.float32)
        if Rp != R:
            loc2d = jnp.pad(loc2d, ((0, Rp - R), (0, 0)))
        in_specs.append(pl.BlockSpec((tm_eff, L), lambda i: (i, 0)))
        inputs.append(loc2d)
        w_loc = params["w_loc"].astype(jnp.float32)
        flops += 2 * Rp * L * H
    else:
        L = 0
        w_loc = None

    in_specs.append(pl.BlockSpec((V, H), lambda i: (0, 0)))    # resident W_img
    inputs.append(w_img)
    if use_location_embed:
        in_specs.append(pl.BlockSpec((L, H), lambda i: (0, 0)))
        inputs.append(w_loc)
    for p in (bias, gamma, beta):
        in_specs.append(pl.BlockSpec((1, H), lambda i: (0, 0)))
        inputs.append(p)

    flops += 10 * Rp * H   # LayerNorm / affine elementwise work
    bytes_accessed = (
        x2d.size * x2d.dtype.itemsize
        + w_img.size * w_img.dtype.itemsize
        + Rp * H * jnp.dtype(out_dtype).itemsize
        + ((loc2d.size + w_loc.size) * 4 if use_location_embed else 0)
        + 3 * H * 4)

    kernel = functools.partial(_image_embeddings_kernel,
                               use_loc=use_location_embed, n_loc=L)

    out2d = pl.pallas_call(
        kernel,
        out_shape=jax.ShapeDtypeStruct((Rp, H), out_dtype),
        grid_spec=pltpu.PrefetchScalarGridSpec(
            num_scalar_prefetch=0,
            grid=grid,
            in_specs=in_specs,
            out_specs=pl.BlockSpec((tm_eff, H), lambda i: (i, 0)),
        ),
        compiler_params=pltpu.CompilerParams(
            dimension_semantics=("parallel",),
            vmem_limit_bytes=vmem_limit_bytes),
        cost_estimate=pl.CostEstimate(
            flops=int(flops),
            transcendentals=int(Rp),
            bytes_accessed=int(bytes_accessed)),
    )(*inputs)

    return out2d[:R].reshape(B, S, H)


def init_params(key, v_feature_size, hidden_size):
    k1, k2, k3, k4 = jax.random.split(key, 4)
    # Stored already transposed: x @ W with W of shape (in, out), matching
    # PyTorch's x @ W^T where W is (out, in).
    w_img = jax.random.normal(k1, (v_feature_size, hidden_size), jnp.float32) * 0.02
    b_img = jax.random.normal(k2, (1, hidden_size), jnp.float32) * 0.02
    w_loc = jax.random.normal(k3, (5, hidden_size), jnp.float32) * 0.02
    b_loc = jax.random.normal(k4, (1, hidden_size), jnp.float32) * 0.02
    gamma = jnp.ones((1, hidden_size), jnp.float32)
    beta = jnp.zeros((1, hidden_size), jnp.float32)
    return dict(w_img=w_img, b_img=b_img, w_loc=w_loc, b_loc=b_loc,
                gamma=gamma, beta=beta)


def reference_forward(input_ids, input_loc, params, *, use_location_embed=True):
    e = input_ids @ params["w_img"] + params["b_img"][0]
    if use_location_embed:
        e = e + input_loc @ params["w_loc"] + params["b_loc"][0]
    mu = e.mean(-1, keepdims=True)
    var = ((e - mu) ** 2).mean(-1, keepdims=True)
    n = (e - mu) / jnp.sqrt(var + 1e-12)
    return n * params["gamma"][0] + params["beta"][0]


if __name__ == "__main__":
    # Small shapes: batch=2, seq(regions)=8, v_feature_size=64, hidden=32.
    B, S, V, H = 2, 8, 64, 32
    key = jax.random.PRNGKey(0)
    k_x, k_loc, k_p = jax.random.split(key, 3)

    input_ids = jax.random.normal(k_x, (B, S, V), jnp.float32)
    input_loc = jax.random.uniform(k_loc, (B, S, 5), jnp.float32)
    params = init_params(k_p, V, H)

    ref = reference_forward(input_ids, input_loc, params)

    # 1) f32 compute path -- tight tolerance.
    out_f32 = jax.block_until_ready(
        image_embeddings_forward(input_ids, input_loc, params,
                                 compute_dtype=jnp.float32))
    assert out_f32.shape == (B, S, H)
    assert jnp.allclose(out_f32, ref, atol=2e-4, rtol=2e-4)

    # 2) default bf16-weight path -- looser tolerance (LayerNorm absorbs most
    #    of the quantization noise).
    out_bf16 = jax.block_until_ready(
        image_embeddings_forward(input_ids, input_loc, params))
    assert out_bf16.shape == (B, S, H)
    assert jnp.allclose(out_bf16, ref, atol=3e-2, rtol=3e-2)

    # 3) ragged row count (R = 18, not a multiple of 8) -> padded-tile path.
    S2 = 9
    ids2 = jax.random.normal(k_x, (B, S2, V), jnp.float32)
    loc2 = jax.random.uniform(k_loc, (B, S2, 5), jnp.float32)
    ref2 = reference_forward(ids2, loc2, params)
    out2 = jax.block_until_ready(
        image_embeddings_forward(ids2, loc2, params,
                                 compute_dtype=jnp.float32))
    assert out2.shape == (B, S2, H)
    assert jnp.allclose(out2, ref2, atol=2e-4, rtol=2e-4)

    # 4) use_location_embed=False branch of the module.
    ref3 = reference_forward(input_ids, input_loc, params,
                             use_location_embed=False)
    out3 = jax.block_until_ready(
        image_embeddings_forward(input_ids, input_loc, params,
                                 use_location_embed=False,
                                 compute_dtype=jnp.float32))
    assert jnp.allclose(out3, ref3, atol=2e-4, rtol=2e-4)

    print("KERNEL_OK")
</pallas_src>

<mosaic_0001>
module attributes {stable_mosaic.version = 11 : i64} {
  func.func @_image_embeddings_kernel(%arg0: i32, %arg1: memref<16x64xf32, #tpu.memory_space<vmem>>, %arg2: memref<16x5xf32, #tpu.memory_space<vmem>>, %arg3: memref<64x32xf32, #tpu.memory_space<vmem>>, %arg4: memref<5x32xf32, #tpu.memory_space<vmem>>, %arg5: memref<1x32xf32, #tpu.memory_space<vmem>>, %arg6: memref<1x32xf32, #tpu.memory_space<vmem>>, %arg7: memref<1x32xf32, #tpu.memory_space<vmem>>, %arg8: memref<16x32xf32, #tpu.memory_space<vmem>>) attributes {dimension_semantics = [#tpu.dimension_semantics<parallel>], iteration_bounds = array<i64: 1>, scalar_prefetch = 0 : i64, scratch_operands = 0 : i64, tpu.core_type = #tpu.core_type<tc>, window_params = [{transform_indices = @transform_0, window_bounds = array<i64: 16, 64>}, {transform_indices = @transform_1, window_bounds = array<i64: 16, 5>}, {pipeline_mode = #tpu.pipeline_mode<synchronous>, transform_indices = @transform_2, window_bounds = array<i64: 64, 32>}, {pipeline_mode = #tpu.pipeline_mode<synchronous>, transform_indices = @transform_3, window_bounds = array<i64: 5, 32>}, {pipeline_mode = #tpu.pipeline_mode<synchronous>, transform_indices = @transform_4, window_bounds = array<i64: 1, 32>}, {pipeline_mode = #tpu.pipeline_mode<synchronous>, transform_indices = @transform_5, window_bounds = array<i64: 1, 32>}, {pipeline_mode = #tpu.pipeline_mode<synchronous>, transform_indices = @transform_6, window_bounds = array<i64: 1, 32>}, {transform_indices = @transform_7, window_bounds = array<i64: 16, 32>}]} {
    %c0 = arith.constant 0 : index
    %c0_0 = arith.constant 0 : index
    %0 = vector.load %arg1[%c0, %c0_0] : memref<16x64xf32, #tpu.memory_space<vmem>>, vector<16x64xf32>
    %c0_1 = arith.constant 0 : index
    %c0_2 = arith.constant 0 : index
    %1 = vector.load %arg3[%c0_1, %c0_2] : memref<64x32xf32, #tpu.memory_space<vmem>>, vector<64x32xf32>
    %cst = arith.constant dense<0.000000e+00> : vector<16x32xf32>
    %2 = tpu.matmul %0, %1, %cst {dimension_numbers = #tpu.dot_dimension_numbers<[1], [0], [0], [1], [0, 0, 1, 1], [], []>} : vector<16x64xf32>, vector<64x32xf32>, vector<16x32xf32> -> vector<16x32xf32>
    %c0_3 = arith.constant 0 : index
    %c0_4 = arith.constant 0 : index
    %3 = vector.load %arg5[%c0_3, %c0_4] : memref<1x32xf32, #tpu.memory_space<vmem>>, vector<1x32xf32>
    %4 = vector.broadcast %3 : vector<1x32xf32> to vector<16x32xf32>
    %5 = arith.addf %2, %4 : vector<16x32xf32>
    %c0_5 = arith.constant 0 : index
    %c0_6 = arith.constant 0 : index
    %6 = vector.load %arg2[%c0_5, %c0_6] : memref<16x5xf32, #tpu.memory_space<vmem>>, vector<16x5xf32>
    %c0_7 = arith.constant 0 : index
    %c0_8 = arith.constant 0 : index
    %7 = vector.load %arg4[%c0_7, %c0_8] : memref<5x32xf32, #tpu.memory_space<vmem>>, vector<5x32xf32>
    %8 = vector.extract_strided_slice %6 {offsets = [0, 0], sizes = [16, 1], strides = [1, 1]} : vector<16x5xf32> to vector<16x1xf32>
    %9 = vector.extract_strided_slice %7 {offsets = [0, 0], sizes = [1, 32], strides = [1, 1]} : vector<5x32xf32> to vector<1x32xf32>
    %10 = vector.broadcast %8 : vector<16x1xf32> to vector<16x32xf32>
    %11 = vector.broadcast %9 : vector<1x32xf32> to vector<16x32xf32>
    %12 = arith.mulf %10, %11 : vector<16x32xf32>
    %13 = arith.addf %5, %12 : vector<16x32xf32>
    %14 = vector.extract_strided_slice %6 {offsets = [0, 1], sizes = [16, 1], strides = [1, 1]} : vector<16x5xf32> to vector<16x1xf32>
    %15 = vector.extract_strided_slice %7 {offsets = [1, 0], sizes = [1, 32], strides = [1, 1]} : vector<5x32xf32> to vector<1x32xf32>
    %16 = vector.broadcast %14 : vector<16x1xf32> to vector<16x32xf32>
    %17 = vector.broadcast %15 : vector<1x32xf32> to vector<16x32xf32>
    %18 = arith.mulf %16, %17 : vector<16x32xf32>
    %19 = arith.addf %13, %18 : vector<16x32xf32>
    %20 = vector.extract_strided_slice %6 {offsets = [0, 2], sizes = [16, 1], strides = [1, 1]} : vector<16x5xf32> to vector<16x1xf32>
    %21 = vector.extract_strided_slice %7 {offsets = [2, 0], sizes = [1, 32], strides = [1, 1]} : vector<5x32xf32> to vector<1x32xf32>
    %22 = vector.broadcast %20 : vector<16x1xf32> to vector<16x32xf32>
    %23 = vector.broadcast %21 : vector<1x32xf32> to vector<16x32xf32>
    %24 = arith.mulf %22, %23 : vector<16x32xf32>
    %25 = arith.addf %19, %24 : vector<16x32xf32>
    %26 = vector.extract_strided_slice %6 {offsets = [0, 3], sizes = [16, 1], strides = [1, 1]} : vector<16x5xf32> to vector<16x1xf32>
    %27 = vector.extract_strided_slice %7 {offsets = [3, 0], sizes = [1, 32], strides = [1, 1]} : vector<5x32xf32> to vector<1x32xf32>
    %28 = vector.broadcast %26 : vector<16x1xf32> to vector<16x32xf32>
    %29 = vector.broadcast %27 : vector<1x32xf32> to vector<16x32xf32>
    %30 = arith.mulf %28, %29 : vector<16x32xf32>
    %31 = arith.addf %25, %30 : vector<16x32xf32>
    %32 = vector.extract_strided_slice %6 {offsets = [0, 4], sizes = [16, 1], strides = [1, 1]} : vector<16x5xf32> to vector<16x1xf32>
    %33 = vector.extract_strided_slice %7 {offsets = [4, 0], sizes = [1, 32], strides = [1, 1]} : vector<5x32xf32> to vector<1x32xf32>
    %34 = vector.broadcast %32 : vector<16x1xf32> to vector<16x32xf32>
    %35 = vector.broadcast %33 : vector<1x32xf32> to vector<16x32xf32>
    %36 = arith.mulf %34, %35 : vector<16x32xf32>
    %37 = arith.addf %31, %36 : vector<16x32xf32>
    %cst_9 = arith.constant dense<0.000000e+00> : vector<16xf32>
    %38 = vector.multi_reduction <add>, %37, %cst_9 [1] : vector<16x32xf32> to vector<16xf32>
    %39 = vector.shape_cast %38 : vector<16xf32> to vector<16x1xf32>
    %cst_10 = arith.constant 3.200000e+01 : f32
    %40 = vector.broadcast %cst_10 : f32 to vector<16x1xf32>
    %41 = arith.divf %39, %40 : vector<16x1xf32>
    %42 = vector.broadcast %41 : vector<16x1xf32> to vector<16x32xf32>
    %43 = arith.subf %37, %42 : vector<16x32xf32>
    %44 = arith.mulf %43, %43 : vector<16x32xf32>
    %cst_11 = arith.constant dense<0.000000e+00> : vector<16xf32>
    %45 = vector.multi_reduction <add>, %44, %cst_11 [1] : vector<16x32xf32> to vector<16xf32>
    %46 = vector.shape_cast %45 : vector<16xf32> to vector<16x1xf32>
    %cst_12 = arith.constant 3.200000e+01 : f32
    %47 = vector.broadcast %cst_12 : f32 to vector<16x1xf32>
    %48 = arith.divf %46, %47 : vector<16x1xf32>
    %cst_13 = arith.constant 9.99999996E-13 : f32
    %49 = vector.broadcast %cst_13 : f32 to vector<16x1xf32>
    %50 = arith.addf %48, %49 : vector<16x1xf32>
    %51 = math.rsqrt %50 : vector<16x1xf32>
    %52 = vector.broadcast %51 : vector<16x1xf32> to vector<16x32xf32>
    %53 = arith.mulf %43, %52 : vector<16x32xf32>
    %c0_14 = arith.constant 0 : index
    %c0_15 = arith.constant 0 : index
    %54 = vector.load %arg6[%c0_14, %c0_15] : memref<1x32xf32, #tpu.memory_space<vmem>>, vector<1x32xf32>
    %55 = vector.broadcast %54 : vector<1x32xf32> to vector<16x32xf32>
    %56 = arith.mulf %53, %55 : vector<16x32xf32>
    %c0_16 = arith.constant 0 : index
    %c0_17 = arith.constant 0 : index
    %57 = vector.load %arg7[%c0_16, %c0_17] : memref<1x32xf32, #tpu.memory_space<vmem>>, vector<1x32xf32>
    %58 = vector.broadcast %57 : vector<1x32xf32> to vector<16x32xf32>
    %59 = arith.addf %56, %58 : vector<16x32xf32>
    %c0_18 = arith.constant 0 : index
    %c0_19 = arith.constant 0 : index
    %60 = vector.load %arg8[%c0_18, %c0_19] : memref<16x32xf32, #tpu.memory_space<vmem>>, vector<16x32xf32>
    tpu.vector_store %arg8[%c0_18, %c0_19], %59 {strides = array<i32>} : memref<16x32xf32, #tpu.memory_space<vmem>>, vector<16x32xf32>,
    return
  }
  func.func @transform_0(%arg0: i32) -> (i32, i32) {
    %c0_i32 = arith.constant 0 : i32
    %c0_i32_0 = arith.constant 0 : i32
    return %arg0, %c0_i32 : i32, i32
  }
  func.func @transform_1(%arg0: i32) -> (i32, i32) {
    %c0_i32 = arith.constant 0 : i32
    %c0_i32_0 = arith.constant 0 : i32
    return %arg0, %c0_i32 : i32, i32
  }
  func.func @transform_2(%arg0: i32) -> (i32, i32) {
    %c0_i32 = arith.constant 0 : i32
    %c0_i32_0 = arith.constant 0 : i32
    %c0_i32_1 = arith.constant 0 : i32
    return %c0_i32, %c0_i32_0 : i32, i32
  }
  func.func @transform_3(%arg0: i32) -> (i32, i32) {
    %c0_i32 = arith.constant 0 : i32
    %c0_i32_0 = arith.constant 0 : i32
    %c0_i32_1 = arith.constant 0 : i32
    return %c0_i32, %c0_i32_0 : i32, i32
  }
  func.func @transform_4(%arg0: i32) -> (i32, i32) {
    %c0_i32 = arith.constant 0 : i32
    %c0_i32_0 = arith.constant 0 : i32
    %c0_i32_1 = arith.constant 0 : i32
    return %c0_i32, %c0_i32_0 : i32, i32
  }
  func.func @transform_5(%arg0: i32) -> (i32, i32) {
    %c0_i32 = arith.constant 0 : i32
    %c0_i32_0 = arith.constant 0 : i32
    %c0_i32_1 = arith.constant 0 : i32
    return %c0_i32, %c0_i32_0 : i32, i32
  }
  func.func @transform_6(%arg0: i32) -> (i32, i32) {
    %c0_i32 = arith.constant 0 : i32
    %c0_i32_0 = arith.constant 0 : i32
    %c0_i32_1 = arith.constant 0 : i32
    return %c0_i32, %c0_i32_0 : i32, i32
  }
  func.func @transform_7(%arg0: i32) -> (i32, i32) {
    %c0_i32 = arith.constant 0 : i32
    %c0_i32_0 = arith.constant 0 : i32
    return %arg0, %c0_i32 : i32, i32
  }
}

</mosaic_0001>

<bundles_post_ra>
// kernel: tpu_custom_call.1
= control target key start
LH: loop header
LB: loop body
LE: loop exit
PB: predicated region body
PF: predicated region fallthrough
CT: control target
= control target key end

     0   :  { %v287_v3 = vmov 1   ;;  %v288_v5 = vmov 0   ;;  %v289_v7 = vmov 2   ;;  %s393_s0 = inlined_call_operand.vmem [shape: f32[16,64], index: 0, kind: input, shape index: {}]   ;;  %s394_s1 = inlined_call_operand.vmem [shape: f32[16,5], index: 1, kind: input, shape index: {}]   ;;  %s395_s2 = inlined_call_operand.vmem [shape: f32[64,32], index: 2, kind: input, shape index: {}]   ;;  %s396_s3 = inlined_call_operand.vmem [shape: f32[5,32], index: 3, kind: input, shape index: {}]   ;;  %s397_s4 = inlined_call_operand.vmem [shape: f32[1,32], index: 4, kind: input, shape index: {}]   ;;  %s398_s5 = inlined_call_operand.vmem [shape: f32[1,32], index: 5, kind: input, shape index: {}]   ;;  %s399_s6 = inlined_call_operand.vmem [shape: f32[1,32], index: 6, kind: input, shape index: {}]   ;;  %s400_s7 = inlined_call_operand.hbm [shape: f32[16,32], index: 7, kind: output, shape index: {}]  }
   0x1   :  { %v36_v0 = vld [vmem:[%s395_s2 + $0x38] sm:$0xff]  ;;  %v71_v1 = vld [vmem:[%s394_s1] sm:$0xff]  ;;  %v35_v2 = vld [vmem:[%s395_s2 + $0x30] sm:$0xff]  ;;  %245 = vset.pattern.permute.xlu1 %v287_v3  ;;  %244 = vset.pattern.permute.xlu0 %v288_v5 }
   0x2   :  { %56 = vmatpush.msra.mxu0 %v36_v0  ;;  %227 = vmatpush.msra.mxu1 %v36_v0  ;;  %v34_v4 = vld [vmem:[%s395_s2 + $0x28] sm:$0xff]  ;;  %v33_v6 = vld [vmem:[%s395_s2 + $0x20] sm:$0xff] }
   0x3   :  { %90 = vperm.xlu1 %245, %v71_v1   ;;  %76 = vperm.xlu0 %244, %v71_v1  }
   0x4   :  { %57 = vmatpush.msra.mxu0 %v35_v2  ;;  %228 = vmatpush.msra.mxu1 %v35_v2 }
   0x5   :  { %246 = vset.pattern.permute.xlu2 %v289_v7 }
   0x6   :  { %58 = vmatpush.msra.mxu0 %v34_v4 }
   0x7   :  { %12 = vsyncpa [#allocation3], 0  ;;  %229 = vmatpush.msra.mxu1 %v34_v4  ;;  %v32_v8 = vld [vmem:[%s395_s2 + $0x18] sm:$0xff]  ;;  %103 = vperm.xlu2 %246, %v71_v1   ;;  %v72_v9 = vld [vmem:[%s394_s1 + $0x8] sm:$0xff]  ;;  %vm41_vm0 = vcmask 523264   ;;  %v290_v15 = vmov 3  }
   0x8   :  { %59 = vmatpush.msra.mxu0 %v33_v6  ;;  %v31_v10 = vld [vmem:[%s395_s2 + $0x10] sm:$0xff]  ;;  %v30_v11 = vld [vmem:[%s395_s2 + $0x8] sm:$0xff]  ;;  %v29_v12 = vld [vmem:[%s395_s2] sm:$0xff]  ;;  %v291_v16 = vmov 4   ;;  %vm141_vm1 = vcmask 261120   ;;  %v292_v60 = vmov 32.0  }
   0x9   :  { %230 = vmatpush.msra.mxu1 %v33_v6  ;;  %v27_v13 = vld [vmem:[%s393_s0] sm:$0xff]  ;;  %v28_v14 = vld [vmem:[%s393_s0 + $0x8] sm:$0xff]  ;;  %255 = vrcp.f32 %v292_v60  ;;  %s293_s28 = smov [#allocation2]   ;;  %s213_s9 = sshll.u32 %s400_s7, 4  ;;  %s214_s9 = int_to_ptr.hbm [resolvable:$true] %s213_s9 }
   0xa   :  { %60 = vmatpush.msra.mxu0 %v32_v8  ;;  %v73_v23 = vld [vmem:[%s396_s3] sm:$0x1f]  ;;  %s211_s29 = sshll.u32 %s293_s28, 4  ;;  %s295_s10 = smov 8   ;;  %s212_s29 = int_to_ptr.vmem [resolvable:$true] %s211_s29 }
   0xb   :  { %231 = vmatpush.msra.mxu1 %v32_v8  ;;  %94 = vperm.xlu1 %245, %v72_v9   ;;  %v84_v25 = vperm.slane %v73_v23, 0  ;;  %v252_v26 = vld [vmem:[%s397_s4] ss:$0 sm:$0xff]  ;;  %v97_v27 = vperm.slane %v73_v23, 1  ;;  %v110_v30 = vperm.slane %v73_v23, 2  ;;  %v123_v37 = vperm.slane %v73_v23, 3 }
   0xc   :  { %61 = vmatpush.msra.mxu0 %v31_v10  ;;  %81 = vperm.xlu0 %244, %v72_v9   ;;  %v136_v39 = vperm.slane %v73_v23, 4 }
   0xd   :  { %232 = vmatpush.msra.mxu1 %v31_v10 }
   0xe   :  { %62 = vmatpush.msra.mxu0 %v30_v11 }
   0xf   :  { %233 = vmatpush.msra.mxu1 %v30_v11  ;;  %107 = vperm.xlu2 %246, %v72_v9   ;;  %v256_v61 = vpop.eup %255 }
  0x10   :  { %63 = vmatpush.msra.mxu0 %v29_v12  ;;  %v149_v62 = vmul.f32 32.0, %v256_v61  ;;  %vm153_vm2 = vweird.f32 %v256_v61 }
  0x11   :  { %234 = vmatpush.msra.mxu1 %v29_v12  ;;  %225 = vmatmul.msk.f32.vlgmr.msra.gmra.mxu0 %vm41_vm0, %v27_v13 }
  0x12   :  { %226 = vmatmul.msk.f32.vlgmr.msra.gmra.mxu1 %vm41_vm0, %v28_v14  ;;  %v150_v63 = vsub.f32 1.0, %v149_v62 }
  0x13   :  { %248 = vset.pattern.permute.xlu1 %v290_v15 }
  0x14   :  { %120 = vperm.xlu1 %248, %v72_v9   ;;  %247 = vset.pattern.permute.xlu0 %v290_v15  ;;  %v151_v0 = vmul.f32 %v256_v61, %v150_v63 }
  0x15   :  { %116 = vperm.xlu0 %247, %v71_v1  }
  0x17   :  { %249 = vset.pattern.permute.xlu2 %v291_v16 }
  0x18   :  { %129 = vperm.xlu2 %249, %v71_v1   ;;  %v152_v1 = vadd.f32 %v256_v61, %v151_v0 }
  0x1a   :  { %v154_v2 = vsel %vm153_vm2, %v256_v61, %v152_v1 }
  0x1c   :  { %250 = vset.pattern.permute.xlu1 %v291_v16 }
  0x1d   :  { %133 = vperm.xlu1 %250, %v72_v9   ;;  %251 = vset.pattern.permute.xlu0 %v291_v16 }
  0x61   :  { %v104_v19 = vpop.permute.xlu2 %103 }
  0x62   :  { %v111_v43 = vmul.f32 %v110_v30, %v104_v19 }
  0x69   :  { %v108_v24 = vpop.permute.xlu2 %107 }
  0x6a   :  { %v112_v47 = vmul.f32 %v110_v30, %v108_v24  ;;  %v253_v30 = vld [vmem:[%s398_s5] ss:$0 sm:$0xff]  ;;  %s294_s5 = smov 128  }
  0x72   :  { %v130_v42 = vpop.permute.xlu2 %129 }
  0x73   :  { %v137_v50 = vmul.f32 %v136_v39, %v130_v42 }
  0x75   :  { %v91_v17 = vpop.permute.xlu1 %90  ;;  %v77_v18 = vpop.permute.xlu0 %76 }
  0x76   :  { %v85_v29 = vmul.f32 %v84_v25, %v77_v18  ;;  %v98_v36 = vmul.f32 %v97_v27, %v91_v17 }
  0x7d   :  { %v95_v20 = vpop.permute.xlu1 %94 }
  0x7e   :  { %v82_v21 = vpop.permute.xlu0 %81  ;;  %v99_v40 = vmul.f32 %v97_v27, %v95_v20 }
  0x7f   :  { %v86_v33 = vmul.f32 %v84_v25, %v82_v21 }
  0x86   :  { %v121_v22 = vpop.permute.xlu1 %120 }
  0x87   :  { %v117_v35 = vpop.permute.xlu0 %116  ;;  %v125_v51 = vmul.f32 %v123_v37, %v121_v22 }
  0x88   :  { %v124_v45 = vmul.f32 %v123_v37, %v117_v35  ;;  %v254_v35 = vld [vmem:[%s399_s6] ss:$0 sm:$0xff] }
  0x8e   :  { %v65_v28 = vpop.f32.mrf.mxu0 }
  0x8f   :  { %v66_v31 = vadd.f32 %v252_v26, %v65_v28  ;;  %v68_v32 = vpop.f32.mrf.mxu1  ;;  %v134_v46 = vpop.permute.xlu1 %133 }
  0x90   :  { %v69_v34 = vadd.f32 %v252_v26, %v68_v32  ;;  %v138_v52 = vmul.f32 %v136_v39, %v134_v46 }
  0x91   :  { %v87_v38 = vadd.f32 %v85_v29, %v66_v31 }
  0x92   :  { %v88_v41 = vadd.f32 %v86_v33, %v69_v34 }
  0x93   :  { %v100_v44 = vadd.f32 %v98_v36, %v87_v38 }
  0x94   :  { %v101_v48 = vadd.f32 %v99_v40, %v88_v41 }
  0x95   :  { %v113_v49 = vadd.f32 %v111_v43, %v100_v44 }
  0x96   :  { %v114_v53 = vadd.f32 %v112_v47, %v101_v48 }
  0x97   :  { %v126_v54 = vadd.f32 %v124_v45, %v113_v49 }
  0x98   :  { %v127_v55 = vadd.f32 %v125_v51, %v114_v53 }
  0x99   :  { %v139_v56 = vadd.f32 %v137_v50, %v126_v54 }
  0x9a   :  { %v140_v57 = vadd.f32 %v138_v52, %v127_v55 }
  0x9b   :  { %v142_v58 = vsel %vm141_vm1, %v139_v56, 0.0 }
  0x9c   :  { %v145_v59 = vsel %vm141_vm1, %v140_v57, 0.0  ;;  %143 = vadd.xlane.f32.xlu2 %v142_v58 }
  0x9d   :  { %146 = vadd.xlane.f32.xlu0 %v145_v59 }
 0x10f   :  { %v144_v3 = vpop.xlane.xlu2 %143 }
 0x110   :  { %v147_v4 = vpop.xlane.xlu0 %146  ;;  %v155_v5 = vmul.f32 %v154_v2, %v144_v3 }
 0x111   :  { %v156_v6 = vmul.f32 %v154_v2, %v147_v4 }
 0x112   :  { %v157_v7 = vsub.f32 %v139_v56, %v155_v5 }
 0x113   :  { %v158_v8 = vsub.f32 %v140_v57, %v156_v6 }
 0x114   :  { %v159_v9 = vmul.f32 %v157_v7, %v157_v7 }
 0x115   :  { %v160_v10 = vmul.f32 %v158_v8, %v158_v8 }
 0x116   :  { %v161_v11 = vsel %vm141_vm1, %v159_v9, 0.0 }
 0x117   :  { %v164_v12 = vsel %vm141_vm1, %v160_v10, 0.0  ;;  %162 = vadd.xlane.f32.xlu1 %v161_v11 }
 0x118   :  { %165 = vadd.xlane.f32.xlu2 %v164_v12 }
 0x18a   :  { %v163_v13 = vpop.xlane.xlu1 %162 }
 0x18b   :  { %v167_v14 = vmul.f32 %v163_v13, %v154_v2  ;;  %v166_v15 = vpop.xlane.xlu2 %165 }
 0x18c   :  { %v168_v16 = vmul.f32 %v166_v15, %v154_v2 }
 0x18d   :  { %v169_v17 = vadd.f32 1e-12, %v167_v14 }
 0x18e   :  { %v170_v18 = vadd.f32 1e-12, %v168_v16 }
 0x18f   :  { %257 = vrsqrt.f32 %v169_v17  ;;  %vm177_vm5 = vweird.f32 %v169_v17 }
 0x190   :  { %259 = vrsqrt.f32 %v170_v18  ;;  %vm187_vm7 = vweird.f32 %v170_v18 }
 0x195   :  { %v258_v19 = vpop.eup %257 }
 0x196   :  { %v260_v20 = vpop.eup %259  ;;  %v172_v21 = vmul.f32 %v258_v19, %v169_v17  ;;  %vm178_vm3 = vweird.f32 %v258_v19 }
 0x197   :  { %v182_v22 = vmul.f32 %v260_v20, %v170_v18  ;;  %vm188_vm4 = vweird.f32 %v260_v20  ;;  %vm179_vm6 = vmor %vm177_vm5, %vm178_vm3 }
 0x198   :  { %v173_v23 = vmul.f32 %v258_v19, %v172_v21  ;;  %vm189_vm8 = vmor %vm187_vm7, %vm188_vm4 }
 0x199   :  { %v183_v24 = vmul.f32 %v260_v20, %v182_v22 }
 0x19a   :  { %v174_v25 = vmul.f32 0.5, %v173_v23 }
 0x19b   :  { %v184_v26 = vmul.f32 0.5, %v183_v24 }
 0x19c   :  { %v175_v27 = vsub.f32 1.5, %v174_v25 }
 0x19d   :  { %v185_v28 = vsub.f32 1.5, %v184_v26 }
 0x19e   :  { %v176_v29 = vmul.f32 %v258_v19, %v175_v27 }
 0x19f   :  { %v186_v31 = vmul.f32 %v260_v20, %v185_v28 }
 0x1a0   :  { %v180_v32 = vsel %vm179_vm6, %v258_v19, %v176_v29 }
 0x1a1   :  { %v191_v33 = vmul.f32 %v180_v32, %v157_v7  ;;  %v190_v34 = vsel %vm189_vm8, %v260_v20, %v186_v31 }
 0x1a2   :  { %v192_v36 = vmul.f32 %v190_v34, %v158_v8 }
 0x1a3   :  { %v197_v37 = vmul.f32 %v253_v30, %v191_v33 }
 0x1a4   :  { %v198_v38 = vmul.f32 %v253_v30, %v192_v36 }
 0x1a5   :  { %v203_v39 = vadd.f32 %v254_v35, %v197_v37 }
 0x1a6   :  { %v204_v40 = vadd.f32 %v254_v35, %v198_v38 }
 0x1a7   :  { %205 = vst.msk [vmem:[#allocation2] sm:$0xff] %vm141_vm1, %v203_v39 }
 0x1a8   :  { %206 = vst.msk [vmem:[#allocation2 + $0x8] sm:$0xff] %vm141_vm1, %v204_v40 }
 0x1a9   :  { %219 = dma.vmem_to_hbm [thread:$0]  %s212_s29, 256, %s214_s9, [#allocation3], %s294_s5, %s294_s5, %s295_s10  }
 0x1aa   :  { %285 = dma.done.wait [#allocation3], 256  }
 0x1ab   :  { %286 = vsyncadd [#allocation3], 4294967040 }
 0x1ac   :  { %224 = vsyncpa [#allocation3], 1 }

</bundles_post_ra>
